<compile_context>
chip_gen: v7x
topology: tpu7x:2x2x1
jax: 0.10.0
libtpu: 0.0.40
codegen_flags: <defaults>
</compile_context>

<pallas_src>
import jax
import jax.numpy as jnp
from jax.experimental import pallas as pl
from jax.experimental.pallas import tpu as pltpu


def _make_egcn_kernel(mxu_dtype):
    def egcn_kernel(adj_ref, x_ref, w_ref, out_ref):
        # adj_ref: (N, N)   x_ref: (I, N, D)   w_ref: (I, L, D, D)   out_ref: (I, N, D)
        adj = adj_ref[...].astype(jnp.float32)
        deg = jnp.sum(adj, axis=1, keepdims=True)            # (N, 1) row degrees
        # NOTE: zero-degree rows produce inf/NaN, exactly like torch.inverse(diag(0))
        # in the original; the wrapper/test guarantees self-loops.
        inv_deg = pl.reciprocal(deg, approx=True)            # EUP slot, ~free
        inv_deg = inv_deg * (2.0 - deg * inv_deg)            # 1 Newton step -> ~f32 exact
        norm_adj = (adj * inv_deg).astype(mxu_dtype)         # computed once, shared by all i

        n_egcn = x_ref.shape[0]
        n_layers = w_ref.shape[1]
        # I*L = 6 tiny matmuls here; static unroll is fine.  Switch to
        # lax.fori_loop(..., unroll=True) if in_dimension / gcl_count grow.
        for i in range(n_egcn):
            x = x_ref[i].astype(jnp.float32)                 # (N, D), f32 elementwise
            for l in range(n_layers):
                pooled = jnp.dot(norm_adj, x.astype(mxu_dtype),
                                 preferred_element_type=jnp.float32)       # (N, D)
                x = jnp.maximum(
                    jnp.dot(pooled.astype(mxu_dtype), w_ref[i, l].astype(mxu_dtype),
                            preferred_element_type=jnp.float32),
                    0.0,
                )                                                          # relu, f32
            out_ref[i] = x.astype(out_ref.dtype)

    return egcn_kernel


def egcn_linear_forward(embeddings, adjacency, gcl_weights, *, mxu_dtype=jnp.bfloat16):
    """embeddings: (I, N, D), adjacency: (N, N), gcl_weights: (I, L, D, D) -> (I, N, D)."""
    I, N, D = embeddings.shape
    L = gcl_weights.shape[1]

    flops = I * L * (2 * N * N * D + 2 * N * D * D)
    bytes_accessed = (
        adjacency.size * adjacency.dtype.itemsize
        + embeddings.size * embeddings.dtype.itemsize
        + gcl_weights.size * gcl_weights.dtype.itemsize
        + embeddings.size * embeddings.dtype.itemsize      # output, same shape/dtype
    )

    return pl.pallas_call(
        _make_egcn_kernel(mxu_dtype),
        out_shape=jax.ShapeDtypeStruct((I, N, D), embeddings.dtype),
        grid=(1,),
        in_specs=[
            pl.BlockSpec((N, N), lambda g: (0, 0)),                  # shared adjacency
            pl.BlockSpec((I, N, D), lambda g: (0, 0, 0)),            # all embeddings, native layout
            pl.BlockSpec((I, L, D, D), lambda g: (0, 0, 0, 0)),      # per-EGCN per-layer weights
        ],
        out_specs=pl.BlockSpec((I, N, D), lambda g: (0, 0, 0)),
        cost_estimate=pl.CostEstimate(
            flops=flops, transcendentals=N, bytes_accessed=bytes_accessed),
        compiler_params=pltpu.CompilerParams(dimension_semantics=("arbitrary",)),
    )(adjacency, embeddings, gcl_weights)


def egcn_linear_reference(embeddings, adjacency, gcl_weights):
    """Pure-JAX (f32) reference for validation."""
    deg = jnp.sum(adjacency, axis=1, keepdims=True)
    norm_adj = adjacency / deg
    outs = []
    for i in range(embeddings.shape[0]):
        x = embeddings[i]
        for l in range(gcl_weights.shape[1]):
            x = jax.nn.relu((norm_adj @ x) @ gcl_weights[i, l])
        outs.append(x)
    return jnp.stack(outs, axis=0)


if __name__ == "__main__":
    key = jax.random.PRNGKey(0)
    in_dimension = 3      # number of EGCNs
    out_dimension = 8     # only used by the (unused) linear weight
    N = 16                # number of graph nodes
    D = 32                # embedding_dimensions
    L = 2                 # gcl_count

    k_emb, k_adj, k_w, k_lin = jax.random.split(key, 4)

    # Node embeddings for each EGCN.
    embeddings = jax.random.normal(k_emb, (in_dimension, N, D), dtype=jnp.float32)

    # Binary adjacency with self-loops (guarantees invertible degree matrix).
    adj_bits = (jax.random.uniform(k_adj, (N, N)) > 0.6).astype(jnp.float32)
    adjacency = jnp.clip(adj_bits + adj_bits.T + jnp.eye(N, dtype=jnp.float32), 0.0, 1.0)

    # EGCL weights: xavier_uniform over (D, D)  -> bound = sqrt(6 / (D + D))
    bound = (6.0 / (D + D)) ** 0.5
    gcl_weights = jax.random.uniform(
        k_w, (in_dimension, L, D, D), minval=-bound, maxval=bound, dtype=jnp.float32
    )

    # EGCN_Linear.weight ~ Normal(0, 1); unused in the forward pass (kept for parity).
    linear_weight = jax.random.normal(k_lin, (in_dimension, out_dimension), dtype=jnp.float32)

    ref = egcn_linear_reference(embeddings, adjacency, gcl_weights)

    # Default (performance) path: bf16 MXU operands, f32 accumulation / elementwise.
    out_bf16 = jax.block_until_ready(
        egcn_linear_forward(embeddings, adjacency, gcl_weights))
    assert out_bf16.shape == (in_dimension, N, D)
    assert jnp.allclose(out_bf16, ref, atol=5e-2, rtol=5e-2)

    # Bit-tight path: f32 MXU operands, validates kernel structure to 1e-4.
    out_f32 = jax.block_until_ready(
        egcn_linear_forward(embeddings, adjacency, gcl_weights, mxu_dtype=jnp.float32))
    assert jnp.allclose(out_f32, ref, atol=1e-4, rtol=1e-4)

    print("KERNEL_OK")
</pallas_src>

<mosaic_0001>
module attributes {stable_mosaic.version = 11 : i64} {
  func.func @egcn_kernel(%arg0: i32, %arg1: memref<16x16xf32, #tpu.memory_space<vmem>>, %arg2: memref<3x16x32xf32, #tpu.memory_space<vmem>>, %arg3: memref<3x2x32x32xf32, #tpu.memory_space<vmem>>, %arg4: memref<3x16x32xf32, #tpu.memory_space<vmem>>) attributes {dimension_semantics = [#tpu.dimension_semantics<arbitrary>], iteration_bounds = array<i64: 1>, scalar_prefetch = 0 : i64, scratch_operands = 0 : i64, tpu.core_type = #tpu.core_type<tc>, window_params = [{pipeline_mode = #tpu.pipeline_mode<synchronous>, transform_indices = @transform_0, window_bounds = array<i64: 16, 16>}, {pipeline_mode = #tpu.pipeline_mode<synchronous>, transform_indices = @transform_1, window_bounds = array<i64: 3, 16, 32>}, {pipeline_mode = #tpu.pipeline_mode<synchronous>, transform_indices = @transform_2, window_bounds = array<i64: 3, 2, 32, 32>}, {pipeline_mode = #tpu.pipeline_mode<synchronous>, transform_indices = @transform_3, window_bounds = array<i64: 3, 16, 32>}]} {
    %c0 = arith.constant 0 : index
    %c0_0 = arith.constant 0 : index
    %0 = vector.load %arg1[%c0, %c0_0] : memref<16x16xf32, #tpu.memory_space<vmem>>, vector<16x16xf32>
    %cst = arith.constant dense<0.000000e+00> : vector<16xf32>
    %1 = vector.multi_reduction <add>, %0, %cst [1] : vector<16x16xf32> to vector<16xf32>
    %2 = vector.shape_cast %1 : vector<16xf32> to vector<16x1xf32>
    %3 = tpu.reciprocal %2 {approx = true} : vector<16x1xf32> -> vector<16x1xf32>
    %4 = arith.mulf %2, %3 : vector<16x1xf32>
    %cst_1 = arith.constant 2.000000e+00 : f32
    %5 = vector.broadcast %cst_1 : f32 to vector<16x1xf32>
    %6 = arith.subf %5, %4 : vector<16x1xf32>
    %7 = arith.mulf %3, %6 : vector<16x1xf32>
    %8 = vector.broadcast %7 : vector<16x1xf32> to vector<16x16xf32>
    %9 = arith.mulf %0, %8 : vector<16x16xf32>
    %10 = arith.truncf %9 : vector<16x16xf32> to vector<16x16xbf16>
    %c0_2 = arith.constant 0 : index
    %c0_3 = arith.constant 0 : index
    %c0_4 = arith.constant 0 : index
    %11 = vector.load %arg2[%c0_2, %c0_3, %c0_4] : memref<3x16x32xf32, #tpu.memory_space<vmem>>, vector<1x16x32xf32>
    %12 = vector.shape_cast %11 : vector<1x16x32xf32> to vector<16x32xf32>
    %13 = arith.truncf %12 : vector<16x32xf32> to vector<16x32xbf16>
    %cst_5 = arith.constant dense<0.000000e+00> : vector<16x32xf32>
    %14 = tpu.matmul %10, %13, %cst_5 {dimension_numbers = #tpu.dot_dimension_numbers<[1], [0], [0], [1], [0, 0, 1, 1], [], []>} : vector<16x16xbf16>, vector<16x32xbf16>, vector<16x32xf32> -> vector<16x32xf32>
    %15 = arith.truncf %14 : vector<16x32xf32> to vector<16x32xbf16>
    %c0_6 = arith.constant 0 : index
    %c0_7 = arith.constant 0 : index
    %c0_8 = arith.constant 0 : index
    %c0_9 = arith.constant 0 : index
    %16 = vector.load %arg3[%c0_6, %c0_7, %c0_8, %c0_9] : memref<3x2x32x32xf32, #tpu.memory_space<vmem>>, vector<1x1x32x32xf32>
    %17 = vector.shape_cast %16 : vector<1x1x32x32xf32> to vector<32x32xf32>
    %18 = arith.truncf %17 : vector<32x32xf32> to vector<32x32xbf16>
    %cst_10 = arith.constant dense<0.000000e+00> : vector<16x32xf32>
    %19 = tpu.matmul %15, %18, %cst_10 {dimension_numbers = #tpu.dot_dimension_numbers<[1], [0], [0], [1], [0, 0, 1, 1], [], []>} : vector<16x32xbf16>, vector<32x32xbf16>, vector<16x32xf32> -> vector<16x32xf32>
    %cst_11 = arith.constant 0.000000e+00 : f32
    %20 = vector.broadcast %cst_11 : f32 to vector<16x32xf32>
    %21 = arith.maximumf %19, %20 : vector<16x32xf32>
    %22 = arith.truncf %21 : vector<16x32xf32> to vector<16x32xbf16>
    %cst_12 = arith.constant dense<0.000000e+00> : vector<16x32xf32>
    %23 = tpu.matmul %10, %22, %cst_12 {dimension_numbers = #tpu.dot_dimension_numbers<[1], [0], [0], [1], [0, 0, 1, 1], [], []>} : vector<16x16xbf16>, vector<16x32xbf16>, vector<16x32xf32> -> vector<16x32xf32>
    %24 = arith.truncf %23 : vector<16x32xf32> to vector<16x32xbf16>
    %c0_13 = arith.constant 0 : index
    %c1 = arith.constant 1 : index
    %c0_14 = arith.constant 0 : index
    %c0_15 = arith.constant 0 : index
    %25 = vector.load %arg3[%c0_13, %c1, %c0_14, %c0_15] : memref<3x2x32x32xf32, #tpu.memory_space<vmem>>, vector<1x1x32x32xf32>
    %26 = vector.shape_cast %25 : vector<1x1x32x32xf32> to vector<32x32xf32>
    %27 = arith.truncf %26 : vector<32x32xf32> to vector<32x32xbf16>
    %cst_16 = arith.constant dense<0.000000e+00> : vector<16x32xf32>
    %28 = tpu.matmul %24, %27, %cst_16 {dimension_numbers = #tpu.dot_dimension_numbers<[1], [0], [0], [1], [0, 0, 1, 1], [], []>} : vector<16x32xbf16>, vector<32x32xbf16>, vector<16x32xf32> -> vector<16x32xf32>
    %cst_17 = arith.constant 0.000000e+00 : f32
    %29 = vector.broadcast %cst_17 : f32 to vector<16x32xf32>
    %30 = arith.maximumf %28, %29 : vector<16x32xf32>
    %c0_18 = arith.constant 0 : index
    %c0_19 = arith.constant 0 : index
    %c0_20 = arith.constant 0 : index
    %31 = vector.load %arg4[%c0_18, %c0_19, %c0_20] : memref<3x16x32xf32, #tpu.memory_space<vmem>>, vector<1x16x32xf32>
    %32 = vector.shape_cast %31 : vector<1x16x32xf32> to vector<16x32xf32>
    %33 = vector.shape_cast %30 : vector<16x32xf32> to vector<1x16x32xf32>
    tpu.vector_store %arg4[%c0_18, %c0_19, %c0_20], %33 {strides = array<i32>} : memref<3x16x32xf32, #tpu.memory_space<vmem>>, vector<1x16x32xf32>,
    %c1_21 = arith.constant 1 : index
    %c0_22 = arith.constant 0 : index
    %c0_23 = arith.constant 0 : index
    %34 = vector.load %arg2[%c1_21, %c0_22, %c0_23] : memref<3x16x32xf32, #tpu.memory_space<vmem>>, vector<1x16x32xf32>
    %35 = vector.shape_cast %34 : vector<1x16x32xf32> to vector<16x32xf32>
    %36 = arith.truncf %35 : vector<16x32xf32> to vector<16x32xbf16>
    %cst_24 = arith.constant dense<0.000000e+00> : vector<16x32xf32>
    %37 = tpu.matmul %10, %36, %cst_24 {dimension_numbers = #tpu.dot_dimension_numbers<[1], [0], [0], [1], [0, 0, 1, 1], [], []>} : vector<16x16xbf16>, vector<16x32xbf16>, vector<16x32xf32> -> vector<16x32xf32>
    %38 = arith.truncf %37 : vector<16x32xf32> to vector<16x32xbf16>
    %c1_25 = arith.constant 1 : index
    %c0_26 = arith.constant 0 : index
    %c0_27 = arith.constant 0 : index
    %c0_28 = arith.constant 0 : index
    %39 = vector.load %arg3[%c1_25, %c0_26, %c0_27, %c0_28] : memref<3x2x32x32xf32, #tpu.memory_space<vmem>>, vector<1x1x32x32xf32>
    %40 = vector.shape_cast %39 : vector<1x1x32x32xf32> to vector<32x32xf32>
    %41 = arith.truncf %40 : vector<32x32xf32> to vector<32x32xbf16>
    %cst_29 = arith.constant dense<0.000000e+00> : vector<16x32xf32>
    %42 = tpu.matmul %38, %41, %cst_29 {dimension_numbers = #tpu.dot_dimension_numbers<[1], [0], [0], [1], [0, 0, 1, 1], [], []>} : vector<16x32xbf16>, vector<32x32xbf16>, vector<16x32xf32> -> vector<16x32xf32>
    %cst_30 = arith.constant 0.000000e+00 : f32
    %43 = vector.broadcast %cst_30 : f32 to vector<16x32xf32>
    %44 = arith.maximumf %42, %43 : vector<16x32xf32>
    %45 = arith.truncf %44 : vector<16x32xf32> to vector<16x32xbf16>
    %cst_31 = arith.constant dense<0.000000e+00> : vector<16x32xf32>
    %46 = tpu.matmul %10, %45, %cst_31 {dimension_numbers = #tpu.dot_dimension_numbers<[1], [0], [0], [1], [0, 0, 1, 1], [], []>} : vector<16x16xbf16>, vector<16x32xbf16>, vector<16x32xf32> -> vector<16x32xf32>
    %47 = arith.truncf %46 : vector<16x32xf32> to vector<16x32xbf16>
    %c1_32 = arith.constant 1 : index
    %c1_33 = arith.constant 1 : index
    %c0_34 = arith.constant 0 : index
    %c0_35 = arith.constant 0 : index
    %48 = vector.load %arg3[%c1_32, %c1_33, %c0_34, %c0_35] : memref<3x2x32x32xf32, #tpu.memory_space<vmem>>, vector<1x1x32x32xf32>
    %49 = vector.shape_cast %48 : vector<1x1x32x32xf32> to vector<32x32xf32>
    %50 = arith.truncf %49 : vector<32x32xf32> to vector<32x32xbf16>
    %cst_36 = arith.constant dense<0.000000e+00> : vector<16x32xf32>
    %51 = tpu.matmul %47, %50, %cst_36 {dimension_numbers = #tpu.dot_dimension_numbers<[1], [0], [0], [1], [0, 0, 1, 1], [], []>} : vector<16x32xbf16>, vector<32x32xbf16>, vector<16x32xf32> -> vector<16x32xf32>
    %cst_37 = arith.constant 0.000000e+00 : f32
    %52 = vector.broadcast %cst_37 : f32 to vector<16x32xf32>
    %53 = arith.maximumf %51, %52 : vector<16x32xf32>
    %c1_38 = arith.constant 1 : index
    %c0_39 = arith.constant 0 : index
    %c0_40 = arith.constant 0 : index
    %54 = vector.load %arg4[%c1_38, %c0_39, %c0_40] : memref<3x16x32xf32, #tpu.memory_space<vmem>>, vector<1x16x32xf32>
    %55 = vector.shape_cast %54 : vector<1x16x32xf32> to vector<16x32xf32>
    %56 = vector.shape_cast %53 : vector<16x32xf32> to vector<1x16x32xf32>
    tpu.vector_store %arg4[%c1_38, %c0_39, %c0_40], %56 {strides = array<i32>} : memref<3x16x32xf32, #tpu.memory_space<vmem>>, vector<1x16x32xf32>,
    %c2 = arith.constant 2 : index
    %c0_41 = arith.constant 0 : index
    %c0_42 = arith.constant 0 : index
    %57 = vector.load %arg2[%c2, %c0_41, %c0_42] : memref<3x16x32xf32, #tpu.memory_space<vmem>>, vector<1x16x32xf32>
    %58 = vector.shape_cast %57 : vector<1x16x32xf32> to vector<16x32xf32>
    %59 = arith.truncf %58 : vector<16x32xf32> to vector<16x32xbf16>
    %cst_43 = arith.constant dense<0.000000e+00> : vector<16x32xf32>
    %60 = tpu.matmul %10, %59, %cst_43 {dimension_numbers = #tpu.dot_dimension_numbers<[1], [0], [0], [1], [0, 0, 1, 1], [], []>} : vector<16x16xbf16>, vector<16x32xbf16>, vector<16x32xf32> -> vector<16x32xf32>
    %61 = arith.truncf %60 : vector<16x32xf32> to vector<16x32xbf16>
    %c2_44 = arith.constant 2 : index
    %c0_45 = arith.constant 0 : index
    %c0_46 = arith.constant 0 : index
    %c0_47 = arith.constant 0 : index
    %62 = vector.load %arg3[%c2_44, %c0_45, %c0_46, %c0_47] : memref<3x2x32x32xf32, #tpu.memory_space<vmem>>, vector<1x1x32x32xf32>
    %63 = vector.shape_cast %62 : vector<1x1x32x32xf32> to vector<32x32xf32>
    %64 = arith.truncf %63 : vector<32x32xf32> to vector<32x32xbf16>
    %cst_48 = arith.constant dense<0.000000e+00> : vector<16x32xf32>
    %65 = tpu.matmul %61, %64, %cst_48 {dimension_numbers = #tpu.dot_dimension_numbers<[1], [0], [0], [1], [0, 0, 1, 1], [], []>} : vector<16x32xbf16>, vector<32x32xbf16>, vector<16x32xf32> -> vector<16x32xf32>
    %cst_49 = arith.constant 0.000000e+00 : f32
    %66 = vector.broadcast %cst_49 : f32 to vector<16x32xf32>
    %67 = arith.maximumf %65, %66 : vector<16x32xf32>
    %68 = arith.truncf %67 : vector<16x32xf32> to vector<16x32xbf16>
    %cst_50 = arith.constant dense<0.000000e+00> : vector<16x32xf32>
    %69 = tpu.matmul %10, %68, %cst_50 {dimension_numbers = #tpu.dot_dimension_numbers<[1], [0], [0], [1], [0, 0, 1, 1], [], []>} : vector<16x16xbf16>, vector<16x32xbf16>, vector<16x32xf32> -> vector<16x32xf32>
    %70 = arith.truncf %69 : vector<16x32xf32> to vector<16x32xbf16>
    %c2_51 = arith.constant 2 : index
    %c1_52 = arith.constant 1 : index
    %c0_53 = arith.constant 0 : index
    %c0_54 = arith.constant 0 : index
    %71 = vector.load %arg3[%c2_51, %c1_52, %c0_53, %c0_54] : memref<3x2x32x32xf32, #tpu.memory_space<vmem>>, vector<1x1x32x32xf32>
    %72 = vector.shape_cast %71 : vector<1x1x32x32xf32> to vector<32x32xf32>
    %73 = arith.truncf %72 : vector<32x32xf32> to vector<32x32xbf16>
    %cst_55 = arith.constant dense<0.000000e+00> : vector<16x32xf32>
    %74 = tpu.matmul %70, %73, %cst_55 {dimension_numbers = #tpu.dot_dimension_numbers<[1], [0], [0], [1], [0, 0, 1, 1], [], []>} : vector<16x32xbf16>, vector<32x32xbf16>, vector<16x32xf32> -> vector<16x32xf32>
    %cst_56 = arith.constant 0.000000e+00 : f32
    %75 = vector.broadcast %cst_56 : f32 to vector<16x32xf32>
    %76 = arith.maximumf %74, %75 : vector<16x32xf32>
    %c2_57 = arith.constant 2 : index
    %c0_58 = arith.constant 0 : index
    %c0_59 = arith.constant 0 : index
    %77 = vector.load %arg4[%c2_57, %c0_58, %c0_59] : memref<3x16x32xf32, #tpu.memory_space<vmem>>, vector<1x16x32xf32>
    %78 = vector.shape_cast %77 : vector<1x16x32xf32> to vector<16x32xf32>
    %79 = vector.shape_cast %76 : vector<16x32xf32> to vector<1x16x32xf32>
    tpu.vector_store %arg4[%c2_57, %c0_58, %c0_59], %79 {strides = array<i32>} : memref<3x16x32xf32, #tpu.memory_space<vmem>>, vector<1x16x32xf32>,
    return
  }
  func.func @transform_0(%arg0: i32) -> (i32, i32) {
    %c0_i32 = arith.constant 0 : i32
    %c0_i32_0 = arith.constant 0 : i32
    %c0_i32_1 = arith.constant 0 : i32
    return %c0_i32, %c0_i32_0 : i32, i32
  }
  func.func @transform_1(%arg0: i32) -> (i32, i32, i32) {
    %c0_i32 = arith.constant 0 : i32
    %c0_i32_0 = arith.constant 0 : i32
    %c0_i32_1 = arith.constant 0 : i32
    %c0_i32_2 = arith.constant 0 : i32
    return %c0_i32, %c0_i32_0, %c0_i32_1 : i32, i32, i32
  }
  func.func @transform_2(%arg0: i32) -> (i32, i32, i32, i32) {
    %c0_i32 = arith.constant 0 : i32
    %c0_i32_0 = arith.constant 0 : i32
    %c0_i32_1 = arith.constant 0 : i32
    %c0_i32_2 = arith.constant 0 : i32
    %c0_i32_3 = arith.constant 0 : i32
    return %c0_i32, %c0_i32_0, %c0_i32_1, %c0_i32_2 : i32, i32, i32, i32
  }
  func.func @transform_3(%arg0: i32) -> (i32, i32, i32) {
    %c0_i32 = arith.constant 0 : i32
    %c0_i32_0 = arith.constant 0 : i32
    %c0_i32_1 = arith.constant 0 : i32
    %c0_i32_2 = arith.constant 0 : i32
    return %c0_i32, %c0_i32_0, %c0_i32_1 : i32, i32, i32
  }
}

</mosaic_0001>

<bundles_post_ra>
// kernel: tpu_custom_call.1
= control target key start
LH: loop header
LB: loop body
LE: loop exit
PB: predicated region body
PF: predicated region fallthrough
CT: control target
= control target key end

     0   :  { %8 = vsyncpa [#allocation3], 0  ;;  %s1087_s0 = inlined_call_operand.hbm [shape: f32[16,16], index: 0, kind: input, shape index: {}]   ;;  %s1088_s1 = inlined_call_operand.hbm [shape: f32[3,16,32], index: 1, kind: input, shape index: {}]   ;;  %s1089_s2 = inlined_call_operand.hbm [shape: f32[3,2,32,32], index: 2, kind: input, shape index: {}]   ;;  %s1090_s3 = inlined_call_operand.hbm [shape: f32[3,16,32], index: 3, kind: output, shape index: {}]  }
   0x1   :  { %9 = vsyncpa [#allocation6], 0 }
   0x2   :  { %10 = vsyncpa [#allocation4], 0  ;;  %s922_s12 = smov [#allocation5]   ;;  %s923_s14 = smov [#allocation2]  }
   0x3   :  { %s28_s13 = sshll.u32 %s922_s12, 4  ;;  %s16_s15 = sshll.u32 %s923_s14, 4  ;;  %s29_s13 = int_to_ptr.vmem [resolvable:$true] %s28_s13  ;;  %s950_s15 = int_to_ptr.vmem [resolvable:$true] %s16_s15 }
   0x4   :  { %s828_s18 = scalar_lea.hbm %s1088_s1, 768 }
   0x5   :  { %p829_p0 = scmp.ne.s32.totalorder %s1088_s1, %s828_s18  ;;  %p832_p1 = scmp.lt.u32.totalorder %s828_s18, %s1088_s1 }
   0x7   :  { %p834_p2 = pnand %p832_p1, %p829_p0 }
   0x9   :  { %837 = shalt.err (!%p834_p2)
}
   0xa   :  { %s838_s23 = scalar_lea.vmem %s29_s13, 768  ;;  %p843_p4 = scmp.lt.s32.totalorder %s29_s13, %s29_s13 }
   0xb   :  { %p839_p3 = scmp.ne.s32.totalorder %s29_s13, %s838_s23  ;;  %p844_p5 = scmp.lt.s32.totalorder %s838_s23, %s838_s23 }
   0xd   :  { %p845_p6 = por %p844_p5, %p843_p4 }
   0xf   :  { %p846_p7 = pnand %p845_p6, %p839_p3 }
  0x11   :  { %849 = shalt.err (!%p846_p7)
}
  0x12   :  { %s924_s24 = smov 128   ;;  %s925_s25 = smov 8  }
  0x13   :  { %34 = dma.hbm_to_vmem [thread:$0]  %s1088_s1, 768, %s29_s13, [#allocation6], %s924_s24, %s924_s24, %s925_s25  }
  0x14   :  { %s850_s30 = scalar_lea.hbm %s1087_s0, 256 }
  0x15   :  { %p851_p8 = scmp.ne.s32.totalorder %s1087_s0, %s850_s30  ;;  %p854_p9 = scmp.lt.u32.totalorder %s850_s30, %s1087_s0 }
  0x17   :  { %p856_p10 = pnand %p854_p9, %p851_p8 }
  0x19   :  { %859 = shalt.err (!%p856_p10)
}
  0x1a   :  { %s860_s8 = scalar_lea.vmem %s950_s15, 256  ;;  %p865_p12 = scmp.lt.s32.totalorder %s950_s15, %s950_s15 }
  0x1b   :  { %p861_p11 = scmp.ne.s32.totalorder %s950_s15, %s860_s8  ;;  %p866_p13 = scmp.lt.s32.totalorder %s860_s8, %s860_s8 }
  0x1d   :  { %p867_p0 = por %p866_p13, %p865_p12 }
  0x1f   :  { %p868_p1 = pnand %p867_p0, %p861_p11 }
  0x21   :  { %871 = shalt.err (!%p868_p1)
}
  0x22   :  { %22 = dma.hbm_to_vmem [thread:$0]  %s1087_s0, 256, %s950_s15, [#allocation3], %s924_s24, %s924_s24, %s925_s25  }
  0x23   :  { %s926_s10 = smov [#allocation7]   ;;  %s872_s14 = scalar_lea.hbm %s1089_s2, 3072 }
  0x24   :  { %s40_s11 = sshll.u32 %s926_s10, 4  ;;  %p873_p2 = scmp.ne.s32.totalorder %s1089_s2, %s872_s14  ;;  %s41_s11 = int_to_ptr.vmem [resolvable:$true] %s40_s11 }
  0x25   :  { %p876_p3 = scmp.lt.u32.totalorder %s872_s14, %s1089_s2 }
  0x27   :  { %p878_p4 = pnand %p876_p3, %p873_p2 }
  0x29   :  { %881 = shalt.err (!%p878_p4)
}
  0x2a   :  { %s882_s20 = scalar_lea.vmem %s41_s11, 3072  ;;  %p887_p6 = scmp.lt.s32.totalorder %s41_s11, %s41_s11 }
  0x2b   :  { %p883_p5 = scmp.ne.s32.totalorder %s41_s11, %s882_s20  ;;  %p888_p7 = scmp.lt.s32.totalorder %s882_s20, %s882_s20 }
  0x2d   :  { %p889_p8 = por %p888_p7, %p887_p6 }
  0x2f   :  { %p890_p9 = pnand %p889_p8, %p883_p5 }
  0x31   :  { %893 = shalt.err (!%p890_p9)
}
  0x32   :  { %46 = dma.hbm_to_vmem [thread:$0]  %s1089_s2, 3072, %s41_s11, [#allocation6], %s924_s24, %s924_s24, %s925_s25  }
  0x33   :  { %916 = dma.done.wait [#allocation3], 256  }
  0x34   :  { %917 = vsyncadd [#allocation3], 4294967040 }
  0x35   :  { %918 = dma.done.wait [#allocation6], 3840  }
  0x36   :  { %919 = vsyncadd [#allocation6], 4294963456  ;;  %vm59_vm0 = vcmask 130048   ;;  %v57_v0 = vld [vmem:[#allocation2] sm:$0xff]  ;;  %v58_v1 = vld [vmem:[#allocation2 + $0x8] sm:$0xff]  ;;  %v927_v7 = vmov 0.0  }
  0x37   :  { %v60_v2 = vsel %vm59_vm0, %v57_v0, 0.0  ;;  %v63_v3 = vsel %vm59_vm0, %v58_v1, 0.0  ;;  %v77_v4 = vld [vmem:[#allocation5] sm:$0xff]  ;;  %v78_v5 = vld [vmem:[#allocation5 + $0x8] sm:$0xff]  ;;  %732 = vmatprep.subr.bf16.mxu0 %v927_v7  ;;  %738 = vmatprep.subr.bf16.mxu1 %v927_v7  ;;  %vm928_vm1 = vmmov 0   ;;  %v125_v8 = vld [vmem:[#allocation7] sm:$0xff] }
  0x38   :  { %61 = vadd.xlane.f32.xlu0 %v60_v2  ;;  %v79_v6 = vpack.c.bf16 %v78_v5, %v77_v4  ;;  %734 = vmatprep.mubr.msk.bf16.mxu0 %vm928_vm1, %v927_v7  ;;  %v126_v9 = vld [vmem:[#allocation7 + $0x8] sm:$0xff]  ;;  %v127_v24 = vld [vmem:[#allocation7 + $0x10] sm:$0xff]  ;;  %v128_v25 = vld [vmem:[#allocation7 + $0x18] sm:$0xff]  ;;  %vm131_vm2 = vcmask 261120   ;;  %s929_s2 = smov [#allocation8]  }
  0x39   :  { %742 = vmatprep.mubr.msk.bf16.mxu1 %vm928_vm1, %v927_v7  ;;  %v129_v10 = vpack.c.bf16 %v126_v9, %v125_v8  ;;  %v130_v26 = vpack.c.bf16 %v128_v25, %v127_v24  ;;  %v222_v32 = vld [vmem:[#allocation7 + $0x20] sm:$0xff]  ;;  %v223_v33 = vld [vmem:[#allocation7 + $0x28] sm:$0xff]  ;;  %v224_v45 = vld [vmem:[#allocation7 + $0x30] sm:$0xff]  ;;  %s677_s21 = sshll.u32 %s929_s2, 4  ;;  %s678_s21 = int_to_ptr.vmem [resolvable:$true] %s677_s21 }
  0x3a   :  { %733 = vmatpush3.bf16.msra.mxu0 %v79_v6  ;;  %v226_v34 = vpack.c.bf16 %v223_v33, %v222_v32  ;;  %v277_v41 = vld [vmem:[#allocation5 + $0x10] sm:$0xff]  ;;  %v278_v42 = vld [vmem:[#allocation5 + $0x18] sm:$0xff]  ;;  %v225_v46 = vld [vmem:[#allocation7 + $0x38] sm:$0xff]  ;;  %s894_s22 = scalar_lea.vmem %s678_s21, 768  ;;  %p899_p11 = scmp.lt.s32.totalorder %s678_s21, %s678_s21 }
  0x3b   :  { %746 = vmatprep.subr.bf16.mxu0 %v927_v7  ;;  %739 = vmatpush3.bf16.msra.mxu1 %v129_v10  ;;  %v279_v44 = vpack.c.bf16 %v278_v42, %v277_v41  ;;  %v227_v47 = vpack.c.bf16 %v225_v46, %v224_v45  ;;  %v323_v48 = vld [vmem:[#allocation7 + $0x40] sm:$0xff]  ;;  %v324_v49 = vld [vmem:[#allocation7 + $0x48] sm:$0xff]  ;;  %v325_v56 = vld [vmem:[#allocation7 + $0x50] sm:$0xff]  ;;  %p895_p10 = scmp.ne.s32.totalorder %s678_s21, %s894_s22  ;;  %p900_p12 = scmp.lt.s32.totalorder %s894_s22, %s894_s22 }
  0x3c   :  { %64 = vadd.xlane.f32.xlu0 %v63_v3  ;;  %740 = vmatprep.subr.bf16.mxu1 %v927_v7  ;;  %v327_v53 = vpack.c.bf16 %v324_v49, %v323_v48  ;;  %v326_v57 = vld [vmem:[#allocation7 + $0x58] sm:$0xff]  ;;  %v521_v24 = vld [vmem:[#allocation7 + $0x80] sm:$0xff]  ;;  %v522_v25 = vld [vmem:[#allocation7 + $0x88] sm:$0xff] }
  0x3d   :  { %v328_v58 = vpack.c.bf16 %v326_v57, %v325_v56  ;;  %v523_v32 = vld [vmem:[#allocation7 + $0x90] sm:$0xff]  ;;  %v524_v33 = vld [vmem:[#allocation7 + $0x98] sm:$0xff]  ;;  %v618_v41 = vld [vmem:[#allocation7 + $0xa8] sm:$0xff]  ;;  %p901_p13 = por %p900_p12, %p899_p11 }
  0x3e   :  { %v620_v56 = vld [vmem:[#allocation7 + $0xb8] sm:$0xff] }
  0x3f   :  { %741 = vmatpush3.bf16.msra.mxu1 %v130_v26  ;;  %p902_p0 = pnand %p901_p13, %p895_p10 }
  0x40   :  { %752 = vmatprep.subr.bf16.mxu1 %v927_v7 }
  0xc5   :  { %v62_v11 = vpop.xlane.xlu0 %61 }
  0xc6   :  { %824 = vrcp.f32 %v62_v11 }
  0xc9   :  { %v65_v12 = vpop.xlane.xlu0 %64 }
  0xca   :  { %826 = vrcp.f32 %v65_v12 }
  0xd0   :  { %v825_v13 = vpop.eup %824 }
  0xd1   :  { %v68_v14 = vmul.f32 %v825_v13, %v62_v11 }
  0xd3   :  { %v70_v15 = vsub.f32 2.0, %v68_v14 }
  0xd4   :  { %v827_v16 = vpop.eup %826 }
  0xd5   :  { %v69_v17 = vmul.f32 %v827_v16, %v65_v12  ;;  %v72_v18 = vmul.f32 %v825_v13, %v70_v15 }
  0xd7   :  { %v71_v19 = vsub.f32 2.0, %v69_v17  ;;  %v74_v21 = vmul.f32 %v72_v18, %v57_v0  ;;  %v419_v0 = vld [vmem:[#allocation7 + $0x60] sm:$0xff]  ;;  %v476_v17 = vld [vmem:[#allocation5 + $0x28] sm:$0xff] }
  0xd9   :  { %v73_v20 = vmul.f32 %v827_v16, %v71_v19  ;;  %v475_v16 = vld [vmem:[#allocation5 + $0x20] sm:$0xff] }
  0xda   :  { %v477_v19 = vpack.c.bf16 %v476_v17, %v475_v16 }
  0xdb   :  { %v75_v22 = vmul.f32 %v73_v20, %v58_v1  ;;  %v420_v1 = vld [vmem:[#allocation7 + $0x68] sm:$0xff]  ;;  %v421_v20 = vld [vmem:[#allocation7 + $0x70] sm:$0xff] }
  0xdc   :  { %v423_v2 = vpack.c.bf16 %v420_v1, %v419_v0 }
  0xdd   :  { %v1012_v23 = vpack.c.bf16 %v75_v22, %v74_v21  ;;  %v422_v21 = vld [vmem:[#allocation7 + $0x78] sm:$0xff] }
  0xde   :  { %v424_v22 = vpack.c.bf16 %v422_v21, %v421_v20 }
  0xdf   :  { %735 = vmatmul.mubr.msk.bf16.vlgmr.msra.gmra.mrb[0].mxu0 %vm59_vm0, %v1012_v23 }
  0xe0   :  { %748 = vmatprep.mubr.msk.bf16.mxu0 %vm928_vm1, %v927_v7 }
 0x1b2   :  { %v117_v27 = vpop.f32.mrb[0].mxu0 }
 0x1b3   :  { %v736_v28 = vpop.f32.mrb[1].mxu0 }
 0x1b4   :  { %v120_v29 = vpop.f32.mrb[2].mxu0 }
 0x1b5   :  { %v124_v30 = vpack.c.bf16 %v120_v29, %v117_v27  ;;  %v737_v31 = vpop.f32.mrb[3].mxu0  ;;  %v525_v29 = vpack.c.bf16 %v522_v25, %v521_v24 }
 0x1b7   :  { %743 = vmatmul.mubr.msk.bf16.vlgmr.msra.gmra.mrb[0].mxu1 %vm131_vm2, %v124_v30 }
 0x1b8   :  { %756 = vmatprep.mubr.msk.bf16.mxu1 %vm928_vm1, %v927_v7  ;;  %753 = vmatpush3.bf16.msra.mxu1 %v226_v34  ;;  %v526_v34 = vpack.c.bf16 %v524_v33, %v523_v32 }
 0x1b9   :  { %754 = vmatprep.subr.bf16.mxu1 %v927_v7 }
 0x1bc   :  { %755 = vmatpush3.bf16.msra.mxu1 %v227_v47 }
 0x1bd   :  { %766 = vmatprep.subr.bf16.mxu1 %v927_v7 }
 0x28a   :  { %v169_v35 = vpop.f32.mrb[0].mxu1 }
 0x28b   :  { %v744_v36 = vpop.f32.mrb[1].mxu1  ;;  %v176_v38 = vmax.f32 %v169_v35, 0.0 }
 0x28c   :  { %v172_v37 = vpop.f32.mrb[2].mxu1 }
 0x28d   :  { %v177_v39 = vmax.f32 %v172_v37, 0.0  ;;  %v745_v40 = vpop.f32.mrb[3].mxu1 }
 0x28e   :  { %v617_v40 = vld [vmem:[#allocation7 + $0xa0] sm:$0xff] }
 0x28f   :  { %v178_v43 = vpack.c.bf16 %v177_v39, %v176_v38  ;;  %v621_v42 = vpack.c.bf16 %v618_v41, %v617_v40 }
 0x291   :  { %747 = vmatpush3.bf16.msra.mxu0 %v178_v43 }
 0x292   :  { %760 = vmatprep.subr.bf16.mxu0 %v927_v7 }
 0x294   :  { %749 = vmatmul.mubr.msk.bf16.vlgmr.msra.gmra.mrb[4].mxu0 %vm59_vm0, %v1012_v23 }
 0x295   :  { %761 = vmatpush3.bf16.msra.mxu0 %v279_v44  ;;  %762 = vmatprep.mubr.msk.bf16.mxu0 %vm928_vm1, %v927_v7 }
 0x296   :  { %774 = vmatprep.subr.bf16.mxu0 %v927_v7 }
 0x29c   :  { %763 = vmatmul.mubr.msk.bf16.vlgmr.msra.gmra.mrb[8].mxu0 %vm59_vm0, %v1012_v23 }
 0x29d   :  { %776 = vmatprep.mubr.msk.bf16.mxu0 %vm928_vm1, %v927_v7 }
 0x367   :  { %v213_v50 = vpop.f32.mrb[4].mxu0 }
 0x368   :  { %v750_v51 = vpop.f32.mrb[5].mxu0 }
 0x369   :  { %v216_v52 = vpop.f32.mrb[6].mxu0 }
 0x36a   :  { %v220_v54 = vpack.c.bf16 %v216_v52, %v213_v50  ;;  %v751_v55 = vpop.f32.mrb[7].mxu0 }
 0x36c   :  { %757 = vmatmul.mubr.msk.bf16.vlgmr.msra.gmra.mrb[4].mxu1 %vm131_vm2, %v220_v54 }
 0x36d   :  { %767 = vmatpush3.bf16.msra.mxu1 %v327_v53  ;;  %770 = vmatprep.mubr.msk.bf16.mxu1 %vm928_vm1, %v927_v7 }
 0x36e   :  { %768 = vmatprep.subr.bf16.mxu1 %v927_v7 }
 0x36f   :  { %v314_v59 = vpop.f32.mrb[8].mxu0 }
 0x370   :  { %v764_v60 = vpop.f32.mrb[9].mxu0 }
 0x371   :  { %v317_v61 = vpop.f32.mrb[10].mxu0  ;;  %769 = vmatpush3.bf16.msra.mxu1 %v328_v58 }
 0x372   :  { %v321_v62 = vpack.c.bf16 %v317_v61, %v314_v59  ;;  %v765_v63 = vpop.f32.mrb[11].mxu0  ;;  %780 = vmatprep.subr.bf16.mxu1 %v927_v7 }
 0x374   :  { %771 = vmatmul.mubr.msk.bf16.vlgmr.msra.gmra.mrb[8].mxu1 %vm131_vm2, %v321_v62 }
 0x375   :  { %784 = vmatprep.mubr.msk.bf16.mxu1 %vm928_vm1, %v927_v7  ;;  %781 = vmatpush3.bf16.msra.mxu1 %v423_v2 }
 0x376   :  { %782 = vmatprep.subr.bf16.mxu1 %v927_v7 }
 0x379   :  { %783 = vmatpush3.bf16.msra.mxu1 %v424_v22 }
 0x37a   :  { %794 = vmatprep.subr.bf16.mxu1 %v927_v7 }
 0x43f   :  { %v265_v3 = vpop.f32.mrb[4].mxu1 }
 0x440   :  { %v272_v4 = vmax.f32 %v265_v3, 0.0  ;;  %v758_v5 = vpop.f32.mrb[5].mxu1 }
 0x441   :  { %v268_v6 = vpop.f32.mrb[6].mxu1 }
 0x442   :  { %274 = vst.msk [vmem:[#allocation8] sm:$0xff] %vm131_vm2, %v272_v4  ;;  %v273_v8 = vmax.f32 %v268_v6, 0.0  ;;  %v759_v9 = vpop.f32.mrb[7].mxu1 }
 0x444   :  { %275 = vst.msk [vmem:[#allocation8 + $0x8] sm:$0xff] %vm131_vm2, %v273_v8 }
 0x447   :  { %v366_v10 = vpop.f32.mrb[8].mxu1 }
 0x448   :  { %v772_v11 = vpop.f32.mrb[9].mxu1  ;;  %v373_v13 = vmax.f32 %v366_v10, 0.0 }
 0x449   :  { %v369_v12 = vpop.f32.mrb[10].mxu1 }
 0x44a   :  { %v374_v14 = vmax.f32 %v369_v12, 0.0  ;;  %v773_v15 = vpop.f32.mrb[11].mxu1 }
 0x44c   :  { %v375_v18 = vpack.c.bf16 %v374_v14, %v373_v13 }
 0x44e   :  { %775 = vmatpush3.bf16.msra.mxu0 %v375_v18 }
 0x44f   :  { %788 = vmatprep.subr.bf16.mxu0 %v927_v7 }
 0x451   :  { %777 = vmatmul.mubr.msk.bf16.vlgmr.msra.gmra.mrb[12].mxu0 %vm59_vm0, %v1012_v23 }
 0x452   :  { %789 = vmatpush3.bf16.msra.mxu0 %v477_v19  ;;  %790 = vmatprep.mubr.msk.bf16.mxu0 %vm928_vm1, %v927_v7 }
 0x453   :  { %802 = vmatprep.subr.bf16.mxu0 %v927_v7 }
 0x459   :  { %791 = vmatmul.mubr.msk.bf16.vlgmr.msra.gmra.mrb[16].mxu0 %vm59_vm0, %v1012_v23 }
 0x45a   :  { %804 = vmatprep.mubr.msk.bf16.mxu0 %vm928_vm1, %v927_v7 }
 0x524   :  { %v410_v26 = vpop.f32.mrb[12].mxu0 }
 0x525   :  { %v778_v27 = vpop.f32.mrb[13].mxu0 }
 0x526   :  { %v413_v28 = vpop.f32.mrb[14].mxu0 }
 0x527   :  { %v417_v30 = vpack.c.bf16 %v413_v28, %v410_v26  ;;  %v779_v31 = vpop.f32.mrb[15].mxu0 }
 0x529   :  { %785 = vmatmul.mubr.msk.bf16.vlgmr.msra.gmra.mrb[12].mxu1 %vm131_vm2, %v417_v30 }
 0x52a   :  { %795 = vmatpush3.bf16.msra.mxu1 %v525_v29  ;;  %798 = vmatprep.mubr.msk.bf16.mxu1 %vm928_vm1, %v927_v7 }
 0x52b   :  { %796 = vmatprep.subr.bf16.mxu1 %v927_v7 }
 0x52c   :  { %v512_v35 = vpop.f32.mrb[16].mxu0 }
 0x52d   :  { %v792_v36 = vpop.f32.mrb[17].mxu0 }
 0x52e   :  { %v515_v37 = vpop.f32.mrb[18].mxu0  ;;  %797 = vmatpush3.bf16.msra.mxu1 %v526_v34 }
 0x52f   :  { %v519_v38 = vpack.c.bf16 %v515_v37, %v512_v35  ;;  %v793_v39 = vpop.f32.mrb[19].mxu0  ;;  %808 = vmatprep.subr.bf16.mxu1 %v927_v7 }
 0x531   :  { %799 = vmatmul.mubr.msk.bf16.vlgmr.msra.gmra.mrb[16].mxu1 %vm131_vm2, %v519_v38 }
 0x532   :  { %812 = vmatprep.mubr.msk.bf16.mxu1 %vm928_vm1, %v927_v7  ;;  %809 = vmatpush3.bf16.msra.mxu1 %v621_v42 }
 0x533   :  { %810 = vmatprep.subr.bf16.mxu1 %v927_v7  ;;  %v619_v7 = vld [vmem:[#allocation7 + $0xb0] sm:$0xff] }
 0x534   :  { %v622_v57 = vpack.c.bf16 %v620_v56, %v619_v7 }
 0x536   :  { %811 = vmatpush3.bf16.msra.mxu1 %v622_v57 }
 0x5fc   :  { %v462_v43 = vpop.f32.mrb[12].mxu1 }
 0x5fd   :  { %v469_v44 = vmax.f32 %v462_v43, 0.0  ;;  %v786_v45 = vpop.f32.mrb[13].mxu1 }
 0x5fe   :  { %v465_v46 = vpop.f32.mrb[14].mxu1 }
 0x5ff   :  { %472 = vst.msk [vmem:[#allocation8 + $0x10] sm:$0xff] %vm131_vm2, %v469_v44  ;;  %v470_v47 = vmax.f32 %v465_v46, 0.0  ;;  %v787_v48 = vpop.f32.mrb[15].mxu1 }
 0x601   :  { %473 = vst.msk [vmem:[#allocation8 + $0x18] sm:$0xff] %vm131_vm2, %v470_v47 }
 0x604   :  { %v564_v49 = vpop.f32.mrb[16].mxu1 }
 0x605   :  { %v800_v50 = vpop.f32.mrb[17].mxu1  ;;  %v571_v52 = vmax.f32 %v564_v49, 0.0 }
 0x606   :  { %v567_v51 = vpop.f32.mrb[18].mxu1 }
 0x607   :  { %v572_v53 = vmax.f32 %v567_v51, 0.0  ;;  %v801_v54 = vpop.f32.mrb[19].mxu1 }
 0x609   :  { %v573_v55 = vpack.c.bf16 %v572_v53, %v571_v52 }
 0x60b   :  { %803 = vmatpush3.bf16.msra.mxu0 %v573_v55 }
 0x60e   :  { %805 = vmatmul.mubr.msk.bf16.vlgmr.msra.gmra.mrb[20].mxu0 %vm59_vm0, %v1012_v23 }
 0x6e1   :  { %v608_v58 = vpop.f32.mrb[20].mxu0 }
 0x6e2   :  { %v806_v59 = vpop.f32.mrb[21].mxu0 }
 0x6e3   :  { %v611_v60 = vpop.f32.mrb[22].mxu0 }
 0x6e4   :  { %v615_v61 = vpack.c.bf16 %v611_v60, %v608_v58  ;;  %v807_v62 = vpop.f32.mrb[23].mxu0 }
 0x6e6   :  { %813 = vmatmul.mubr.msk.bf16.vlgmr.msra.gmra.mrb[20].mxu1 %vm131_vm2, %v615_v61 }
 0x7b9   :  { %v660_v63 = vpop.f32.mrb[20].mxu1 }
 0x7ba   :  { %v667_v0 = vmax.f32 %v660_v63, 0.0  ;;  %v814_v1 = vpop.f32.mrb[21].mxu1 }
 0x7bb   :  { %v663_v2 = vpop.f32.mrb[22].mxu1 }
 0x7bc   :  { %670 = vst.msk [vmem:[#allocation8 + $0x20] sm:$0xff] %vm131_vm2, %v667_v0  ;;  %v668_v23 = vmax.f32 %v663_v2, 0.0  ;;  %v815_v3 = vpop.f32.mrb[23].mxu1 }
 0x7be   :  { %671 = vst.msk [vmem:[#allocation8 + $0x28] sm:$0xff] %vm131_vm2, %v668_v23 }
 0x7bf   :  { %905 = shalt.err (!%p902_p0)
}
 0x7c0   :  { %s906_s27 = scalar_lea.hbm %s1090_s3, 768 }
 0x7c1   :  { %p907_p1 = scmp.ne.s32.totalorder %s1090_s3, %s906_s27  ;;  %p910_p2 = scmp.lt.u32.totalorder %s906_s27, %s1090_s3 }
 0x7c3   :  { %p912_p3 = pnand %p910_p2, %p907_p1 }
 0x7c5   :  { %915 = shalt.err (!%p912_p3)
}
 0x7c6   :  { %683 = dma.vmem_to_hbm [thread:$0]  %s678_s21, 768, %s1090_s3, [#allocation4], %s924_s24, %s924_s24, %s925_s25  }
 0x7c7   :  { %920 = dma.done.wait [#allocation4], 768  }
 0x7c8   :  { %921 = vsyncadd [#allocation4], 4294966528 }
 0x7c9   :  { %687 = vsyncpa [#allocation3], 1 }
 0x7ca   :  { %688 = vsyncpa [#allocation6], 1 }
 0x7cb   :  { %689 = vsyncpa [#allocation4], 1 }

</bundles_post_ra>
